<compile_context>
chip_gen: v6e
topology: v6e:2x2x1
jax: 0.10.0
libtpu: 0.0.40
codegen_flags: <defaults>
</compile_context>

<pallas_src>
import functools

import jax
import jax.numpy as jnp
import numpy as np
from jax.experimental import pallas as pl
from jax.experimental.pallas import tpu as pltpu


_FAST_PATH_TABLE_BYTES = 8 * 1024 * 1024  # table <= 8 MiB f32 -> pool from VMEM directly


def _round_up(x, m):
    return (x + m - 1) // m * m


# ----------------------------------------------------------------------------
# Pooling, fast path: whole table in VMEM, per-row gather + per-batch accumulate
# ----------------------------------------------------------------------------
def _pool_vmem_kernel(ids_ref, emb_ref, pooled_ref, *, B_pad, S):
    """ids_ref: SMEM [B_pad*S] int32; emb_ref: VMEM [V, D]; pooled_ref: VMEM [B_pad, D]."""
    D = emb_ref.shape[1]
    inv_s = 1.0 / S

    def batch_body(b, carry):
        def tok_body(s, acc):
            tok = ids_ref[b * S + s]
            return acc + emb_ref[pl.ds(tok, 1), :]          # [1, D] VMEM row gather

        acc = jax.lax.fori_loop(0, S, tok_body, jnp.zeros((1, D), jnp.float32))
        pooled_ref[pl.ds(b, 1), :] = acc * inv_s            # one store per batch row
        return carry

    jax.lax.fori_loop(0, B_pad, batch_body, 0)


def _pool_vmem(ids_flat, emb_table, *, B_pad, S):
    V, D = emb_table.shape
    kernel = functools.partial(_pool_vmem_kernel, B_pad=B_pad, S=S)
    vmem_limit = 2 * V * D * 4 + 2 * B_pad * D * 4 + (4 << 20)
    return pl.pallas_call(
        kernel,
        out_shape=jax.ShapeDtypeStruct((B_pad, D), jnp.float32),
        grid_spec=pltpu.PrefetchScalarGridSpec(
            num_scalar_prefetch=1,                               # flat ids -> SMEM
            grid=(1,),
            in_specs=[pl.BlockSpec((V, D), lambda i, ids: (0, 0))],   # whole table, one bulk DMA
            out_specs=pl.BlockSpec((B_pad, D), lambda i, ids: (0, 0)),
        ),
        compiler_params=pltpu.CompilerParams(
            dimension_semantics=("arbitrary",),
            vmem_limit_bytes=int(vmem_limit)),
    )(ids_flat, emb_table.astype(jnp.float32))


# ----------------------------------------------------------------------------
# Pooling, large-table path: deep manual DMA gather, per-batch [S, D] buffers
# ----------------------------------------------------------------------------
def _pool_gather_kernel(ids_ref, emb_hbm, pooled_ref, rowbuf, sem, *, S, rows_per_step):
    """
    ids_ref   : SMEM [B_pad*S] int32  (flat row-major (b, s) token ids; addressing only)
    emb_hbm   : ANY  [V, D] float32   (embedding table stays in HBM)
    pooled_ref: VMEM [rows_per_step, D] output block for this batch chunk
    rowbuf    : VMEM [2, S, D]        double buffer (one batch element's rows per slot)
    sem       : DMA  [2, S]           one semaphore per in-flight row copy
    """
    base_row = pl.program_id(0) * rows_per_step
    inv_s = 1.0 / S

    def row_copy(global_b, slot, s):
        tok = ids_ref[global_b * S + s]
        return pltpu.make_async_copy(
            emb_hbm.at[pl.ds(tok, 1), :],
            rowbuf.at[slot, pl.ds(s, 1), :],
            sem.at[slot, s])

    def start_rows(global_b, slot):          # S outstanding copies for one batch element
        @pl.loop(0, S)
        def _(s):
            row_copy(global_b, slot, s).start()

    def wait_rows(global_b, slot):           # waits rebuilt from the SAME (src, dst, sem)
        @pl.loop(0, S)
        def _(s):
            row_copy(global_b, slot, s).wait()

    start_rows(base_row, 0)                  # prime the pipeline
    for b_local in range(rows_per_step):     # static unroll (rows_per_step == 8)
        slot = b_local & 1
        if b_local + 1 < rows_per_step:      # prefetch next batch element before blocking
            start_rows(base_row + b_local + 1, 1 - slot)
        wait_rows(base_row + b_local, slot)
        rows = rowbuf[slot]                                          # [S, D]
        pooled_ref[pl.ds(b_local, 1), :] = (
            jnp.sum(rows, axis=0, keepdims=True) * inv_s)            # per-batch reduce


def _pool_gather(ids_flat, emb_table, *, B_pad, S):
    V, D = emb_table.shape
    D_pad = _round_up(D, 128)
    if D_pad != D:
        # TODO(synk): one-time host-side column pad; realistic d_model (512) never hits this.
        emb_table = jnp.pad(emb_table, ((0, 0), (0, D_pad - D)))
    rows_per_step = 8
    kernel = functools.partial(_pool_gather_kernel, S=S, rows_per_step=rows_per_step)
    vmem_limit = 2 * S * D_pad * 4 + 2 * rows_per_step * D_pad * 4 + (4 << 20)
    pooled = pl.pallas_call(
        kernel,
        out_shape=jax.ShapeDtypeStruct((B_pad, D_pad), jnp.float32),
        grid_spec=pltpu.PrefetchScalarGridSpec(
            num_scalar_prefetch=1,                               # flat ids -> SMEM
            grid=(B_pad // rows_per_step,),                      # 8-row batch chunks
            in_specs=[pl.BlockSpec(memory_space=pl.ANY)],        # table stays in HBM
            out_specs=pl.BlockSpec((rows_per_step, D_pad), lambda i, ids: (i, 0)),
            scratch_shapes=[pltpu.VMEM((2, S, D_pad), jnp.float32),
                            pltpu.SemaphoreType.DMA((2, S))],
        ),
        compiler_params=pltpu.CompilerParams(
            dimension_semantics=("parallel",),                   # independent chunks (2 TCs on v7x)
            vmem_limit_bytes=int(vmem_limit)),
    )(ids_flat, emb_table.astype(jnp.float32))
    return pooled[:, :D] if D_pad != D else pooled


def pool_embeddings(src_seq, emb_table, *, impl="auto"):
    """Mean over the full sequence (pad tokens included, matching the reference).

    Returns [B_pad, D] float32; rows >= B hold defined-but-unused values.
    """
    B, S = src_seq.shape
    V, D = emb_table.shape
    B_pad = _round_up(max(B, 8), 8)
    ids = jnp.zeros((B_pad, S), jnp.int32).at[:B, :].set(src_seq.astype(jnp.int32))
    ids_flat = ids.reshape(-1)                       # 1-D prefetch avoids 2-D SMEM lane padding
    table_bytes = V * D * 4
    use_fast = (impl == "vmem") or (impl == "auto" and table_bytes <= _FAST_PATH_TABLE_BYTES)
    if use_fast:
        return _pool_vmem(ids_flat, emb_table, B_pad=B_pad, S=S)
    return _pool_gather(ids_flat, emb_table, B_pad=B_pad, S=S)


# ----------------------------------------------------------------------------
# Projection + sigmoid (vocab-tiled, lane-dense, HBM-bandwidth oriented)
# ----------------------------------------------------------------------------
def _proj_kernel(pooled_ref, wt_ref, out_ref):
    w = wt_ref[...]                                   # [D, tv] in streaming dtype (f32 or bf16)
    a = pooled_ref[...].astype(w.dtype)               # [B_pad, D]
    logits = jnp.dot(a, w, preferred_element_type=jnp.float32)   # f32 MXU accumulation
    out_ref[...] = 1.0 / (1.0 + jnp.exp(-logits))


def _choose_tv(V, D, B_pad, w_bytes, requested=None):
    """Pick a lane-dense vocab tile: big (BW), VMEM-safe on v7x, megacore-friendly."""
    v128 = _round_up(V, 128)
    tv = _round_up(requested, 128) if requested else 2048
    tv = max(128, min(tv, v128))
    budget = 24 * 1024 * 1024          # v7x-safe: 64 MiB physical / 32 MiB default scoped VMEM
    footprint = lambda t: 2 * D * t * w_bytes + 2 * B_pad * t * 4 + 2 * B_pad * D * 4
    while tv > 128 and footprint(tv) > budget:
        tv -= 128
    if requested is None:
        # Prefer >= 8 grid steps for v7x's two cores, but never shrink tiles below 1024
        # (large tiles are the bigger lever for this HBM-bound kernel).
        steps_cap = max(1024, ((v128 // 8) // 128) * 128)
        tv = min(tv, steps_cap)
        tv = max(128, min(tv, v128))
    return tv


def project_and_sigmoid(pooled, weight, *, tv=None, weight_dtype=jnp.float32):
    """pooled [B_pad, D] f32; weight [V, D] (torch nn.Linear layout). Returns [B_pad, V_pad]."""
    B_pad, D = pooled.shape
    V, D_w = weight.shape
    assert D == D_w
    w_bytes = jnp.dtype(weight_dtype).itemsize
    tv = _choose_tv(V, D, B_pad, w_bytes, requested=tv)
    V_pad = _round_up(V, tv)

    # One-time transpose + cast BEFORE the pallas_call: the kernel streams [D, tv] tiles in the
    # narrow dtype directly from HBM (bf16 halves the bytes of this HBM-bound matmul).
    wt = weight.T.astype(weight_dtype)               # [D, V]
    if V_pad != V:
        wt = jnp.pad(wt, ((0, 0), (0, V_pad - V)))

    footprint = 2 * D * tv * w_bytes + 2 * B_pad * tv * 4 + 2 * B_pad * D * 4
    return pl.pallas_call(
        _proj_kernel,
        out_shape=jax.ShapeDtypeStruct((B_pad, V_pad), jnp.float32),
        grid_spec=pltpu.PrefetchScalarGridSpec(
            num_scalar_prefetch=0,
            grid=(V_pad // tv,),
            in_specs=[pl.BlockSpec((B_pad, D), lambda j: (0, 0)),   # small lhs, re-streamed
                      pl.BlockSpec((D, tv), lambda j: (0, j))],     # pre-transposed weight tile
            out_specs=pl.BlockSpec((B_pad, tv), lambda j: (0, j)),  # lane-dense output tile
        ),
        compiler_params=pltpu.CompilerParams(
            dimension_semantics=("parallel",),       # independent vocab tiles (2 TCs on v7x)
            vmem_limit_bytes=int(footprint + (4 << 20))),
    )(pooled, wt)


# ----------------------------------------------------------------------------
# Full forward
# ----------------------------------------------------------------------------
def fasttxt_forward(src_seq, emb_table, fw2_weight, *, tv=None,
                    weight_dtype=jnp.float32, pool_impl="auto"):
    """src_seq [B, S] int; emb_table [V, D]; fw2_weight [V, D] (torch layout). Returns [B, V]."""
    B, _ = src_seq.shape
    V, _ = emb_table.shape
    pooled = pool_embeddings(src_seq, emb_table, impl=pool_impl)        # [B_pad, D]
    out = project_and_sigmoid(pooled, fw2_weight, tv=tv,
                              weight_dtype=weight_dtype)                # [B_pad, V_pad]
    return out[:B, :V]


def xavier_uniform(key, shape):
    fan_out, fan_in = shape[0], shape[1]
    limit = float(np.sqrt(6.0 / (fan_in + fan_out)))
    return jax.random.uniform(key, shape, jnp.float32, -limit, limit)


def _reference(src_seq, emb_table, fw2_weight):
    emb = emb_table[src_seq]                        # [B, S, D]
    pooled = jnp.mean(emb, axis=1)                  # [B, D]
    return jax.nn.sigmoid(pooled @ fw2_weight.T)    # [B, V]


if __name__ == "__main__":
    key = jax.random.PRNGKey(0)
    k1_ids, k1_emb, k1_fw2, k2_ids, k2_emb, k2_fw2 = jax.random.split(key, 6)

    # ---- Test 1: module-sized demo (fast VMEM pooling path, f32 weight streaming) ----
    # vocab=64, d_model=d_word_vec=32, batch=2, seq=8, pad_idx=0.  xavier_uniform_ overwrites
    # the padding_idx row of the embedding table in the reference module -- reproduced here.
    V1, D1, B1, S1 = 64, 32, 2, 8
    emb1 = xavier_uniform(k1_emb, (V1, D1))
    w1 = xavier_uniform(k1_fw2, (V1, D1))
    ids1 = jax.random.randint(k1_ids, (B1, S1), 0, V1, jnp.int32)

    out1 = jax.block_until_ready(fasttxt_forward(ids1, emb1, w1))
    ref1 = _reference(ids1, emb1, w1)
    assert out1.shape == (B1, V1)
    np.testing.assert_allclose(np.asarray(out1), np.asarray(ref1), rtol=1e-5, atol=1e-5)

    # ---- Test 2: forced manual-DMA gather pooling path (deep per-batch pipeline, f32) ----
    V2, D2, B2, S2 = 512, 256, 4, 16
    emb2 = xavier_uniform(k2_emb, (V2, D2))
    w2 = xavier_uniform(k2_fw2, (V2, D2))
    ids2 = jax.random.randint(k2_ids, (B2, S2), 0, V2, jnp.int32)

    out2 = jax.block_until_ready(fasttxt_forward(ids2, emb2, w2, pool_impl="gather"))
    ref2 = _reference(ids2, emb2, w2)
    assert out2.shape == (B2, V2)
    np.testing.assert_allclose(np.asarray(out2), np.asarray(ref2), rtol=1e-5, atol=1e-5)

    # ---- Test 3: bf16 weight streaming for the HBM-bound projection (looser tolerance) ----
    out3 = jax.block_until_ready(
        fasttxt_forward(ids2, emb2, w2, weight_dtype=jnp.bfloat16))
    np.testing.assert_allclose(np.asarray(out3), np.asarray(ref2), rtol=2e-2, atol=2e-2)

    print("KERNEL_OK")
</pallas_src>

<mosaic_0001>
module attributes {stable_mosaic.version = 11 : i64} {
  func.func @_pool_vmem_kernel(%arg0: i32, %arg1: memref<64xi32, #tpu.memory_space<smem>>, %arg2: memref<64x32xf32, #tpu.memory_space<vmem>>, %arg3: memref<8x32xf32, #tpu.memory_space<vmem>>) attributes {dimension_semantics = [#tpu.dimension_semantics<arbitrary>], iteration_bounds = array<i64: 1>, scalar_prefetch = 1 : i64, scratch_operands = 0 : i64, tpu.core_type = #tpu.core_type<tc>, window_params = [{pipeline_mode = #tpu.pipeline_mode<synchronous>, transform_indices = @transform_0, window_bounds = array<i64: 64, 32>}, {pipeline_mode = #tpu.pipeline_mode<synchronous>, transform_indices = @transform_1, window_bounds = array<i64: 8, 32>}]} {
    %c0_i32 = arith.constant 0 : i32
    %c8_i32 = arith.constant 8 : i32
    %0 = arith.addi %c0_i32, %c8_i32 : i32
    %c1_i32 = arith.constant 1 : i32
    scf.for %arg4 = %c0_i32 to %0 step %c1_i32  : i32 {
      %cst = arith.constant 0.000000e+00 : f32
      %1 = vector.broadcast %cst : f32 to vector<1x32xf32>
      %c0_i32_1 = arith.constant 0 : i32
      %c8_i32_2 = arith.constant 8 : i32
      %2 = arith.addi %c0_i32_1, %c8_i32_2 : i32
      %c1_i32_3 = arith.constant 1 : i32
      %3 = scf.for %arg5 = %c0_i32_1 to %2 step %c1_i32_3 iter_args(%arg6 = %1) -> (vector<1x32xf32>)  : i32 {
        %c8_i32_6 = arith.constant 8 : i32
        %8 = arith.muli %arg4, %c8_i32_6 : i32
        %9 = arith.addi %8, %arg5 : i32
        %10 = arith.index_cast %9 : i32 to index
        %11 = memref.load %arg1[%10] : memref<64xi32, #tpu.memory_space<smem>>
        %12 = arith.index_cast %11 : i32 to index
        %c0_7 = arith.constant 0 : index
        %13 = vector.load %arg2[%12, %c0_7] : memref<64x32xf32, #tpu.memory_space<vmem>>, vector<1x32xf32>
        %14 = arith.addf %arg6, %13 : vector<1x32xf32>
        scf.yield %14 : vector<1x32xf32>
      }
      %c8_i32_4 = arith.constant 8 : i32
      %cst_5 = arith.constant 1.250000e-01 : f32
      %4 = vector.broadcast %cst_5 : f32 to vector<1x32xf32>
      %5 = arith.mulf %3, %4 : vector<1x32xf32>
      %6 = arith.index_cast %arg4 : i32 to index
      %c0 = arith.constant 0 : index
      %7 = vector.load %arg3[%6, %c0] : memref<8x32xf32, #tpu.memory_space<vmem>>, vector<1x32xf32>
      tpu.vector_store %arg3[%6, %c0], %5 {strides = array<i32>} : memref<8x32xf32, #tpu.memory_space<vmem>>, vector<1x32xf32>,
    }
    %c8_i32_0 = arith.constant 8 : i32
    return
  }
  func.func @transform_0(%arg0: i32, %arg1: memref<64xi32, #tpu.memory_space<smem>>) -> (i32, i32) {
    %c0_i32 = arith.constant 0 : i32
    %c0_i32_0 = arith.constant 0 : i32
    %c0_i32_1 = arith.constant 0 : i32
    return %c0_i32, %c0_i32_0 : i32, i32
  }
  func.func @transform_1(%arg0: i32, %arg1: memref<64xi32, #tpu.memory_space<smem>>) -> (i32, i32) {
    %c0_i32 = arith.constant 0 : i32
    %c0_i32_0 = arith.constant 0 : i32
    %c0_i32_1 = arith.constant 0 : i32
    return %c0_i32, %c0_i32_0 : i32, i32
  }
}

</mosaic_0001>

<bundles_post_ra>
// kernel: tpu_custom_call.1
= control target key start
LH: loop header
LB: loop body
LE: loop exit
PB: predicated region body
PF: predicated region fallthrough
CT: control target
= control target key end

     0   :  { %s181_s0 = inlined_call_operand.vmem [shape: s32[64], index: 0, kind: input, shape index: {}]   ;;  %s182_s1 = inlined_call_operand.vmem [shape: f32[64,32], index: 1, kind: input, shape index: {}]   ;;  %s183_s2 = inlined_call_operand.hbm [shape: f32[8,32], index: 2, kind: output, shape index: {}]  }
   0x1   :  { %s7_s11 = sshll.u32 %s181_s0, 4  ;;  %s8_s11 = int_to_ptr.vmem [resolvable:$true] %s7_s11 }
   0x2   :  { %s95_s12 = scalar_lea.vmem %s8_s11, 16  ;;  %p100_p1 = scmp.lt.s32.totalorder %s8_s11, %s8_s11 }
   0x3   :  { %p96_p0 = scmp.ne.s32.totalorder %s8_s11, %s95_s12  ;;  %p101_p2 = scmp.lt.s32.totalorder %s95_s12, %s95_s12 }
   0x5   :  { %p102_p3 = por %p101_p2, %p100_p1 }
   0x7   :  { %p103_p4 = pnand %p102_p3, %p96_p0 }
   0x9   :  { %106 = shalt.err (!%p103_p4)  }
   0xa   :  { %s155_s13 = smov [#allocation3]  }
   0xb   :  { %10 = dma.vmem_to_smem %s8_s11, 16, %s155_s13, [#allocation2] }
   0xc   :  { %139 = dma.done.wait [#allocation2], 16 }
   0xd   :  { %140 = vsyncadd [#allocation2], 4294967280 }
   0xe   :  { %12 = sfence }
   0xf   :  { %13 = vsyncpa [#allocation5], 0  ;;  %s143_s14 = smov 0  }
  0x10 LB: > { %v147_v0 = vmov 0.0   ;;  %s151_s0 = smov 0   ;;  %s145_s14 = sphi %s143_s14, %s21_s14  }
  0x11 LB: >> { %s68_s15 = sshll.u32 %s145_s14, 3  ;;  %s153_s0 = sphi %s151_s0, %s27_s0   ;;  %v149_v0 = vphi %v147_v0, %v148_v0  }
  0x12   : >> { %s30_s16 = sadd.s32 %s153_s0, %s68_s15  ;;  %s27_s0 = sadd.s32 1, %s153_s0  }
  0x13   : >> { %s31_s17 = sld [smem:[#allocation3 + %s30_s16]]  ;;  %p24_p5 = scmp.ge.s32.totalorder %s27_s0, 8  }
  0x14   : > { %vm37_vm0 = vcmask (%p24_p5), 253952   ;;  %s36_s21 = scalar_lea.vmem (%p24_p5), [#allocation4], %s145_s14  ;;  %s21_s14 = sadd.s32 (%p24_p5), 1, %s145_s14  }
  0x15   : > { %p18_p6 = scmp.ge.s32.totalorder (%p24_p5), %s21_s14, 8  }
  0x19   : >> { %s32_s20 = scalar_lea.vmem %s182_s1, %s31_s17  ;;  %26 = sbr.rel (!%p24_p5) target bundleno = 17 (0x11), region = 40 }
  0x1a   : >> { %v33_v1 = vld [vmem:[%s32_s20] sm:$0x1] }
  0x1b   : >> { %v34_v2 = vadd.f32 %v149_v0, %v33_v1  }
  0x1d   : >> { %v148_v0 = vmov %v34_v2   ;;  %v35_v3 = vmul.f32 (%p24_p5), 0.125, %v34_v2 }
  0x1e   :  { %20 = sbr.rel (!%p18_p6) target bundleno = 16 (0x10), region = 51  ;;  %s156_s22 = smov (%p18_p6), [#allocation4]  }
  0x1f   : > { %38 = vst.msk [vmem:[%s36_s21] sm:$0x1] %vm37_vm0, %v35_v3  ;;  %s45_s23 = sshll.u32 (%p18_p6), %s156_s22, 4  ;;  %s46_s23 = int_to_ptr.vmem [resolvable:$true] %s45_s23 }
  0x20   :  { %s107_s24 = scalar_lea.vmem (%p18_p6), %s46_s23, 128  ;;  %p112_p8 = scmp.lt.s32.totalorder (%p18_p6), %s46_s23, %s46_s23 }
  0x21   :  { %p108_p7 = scmp.ne.s32.totalorder (%p18_p6), %s46_s23, %s107_s24  ;;  %p113_p9 = scmp.lt.s32.totalorder (%p18_p6), %s107_s24, %s107_s24 }
  0x23   :  { %p114_p10 = por %p113_p9, %p112_p8 }
  0x25   :  { %p115_p11 = pnand %p114_p10, %p108_p7 }
  0x27   :  { %118 = shalt.err (!%p115_p11)
}
  0x28   :  { %48 = dma.vmem_to_hbm [thread:$0]  %s46_s23, 128, %s183_s2, [#allocation5]  }
  0x29   :  { %141 = dma.done.wait [#allocation5], 128  }
  0x2a   :  { %142 = vsyncadd [#allocation5], 4294967168 }
  0x2b   :  { %52 = vsyncpa [#allocation5], 1 }

</bundles_post_ra>
